<compile_context>
chip_gen: v7x
topology: tpu7x:2x2x1
jax: 0.10.0
libtpu: 0.0.40
codegen_flags: <defaults>
</compile_context>

<pallas_src>
import math
import functools

import jax
import jax.numpy as jnp
import numpy as np
from jax import lax
from jax.experimental import pallas as pl
from jax.experimental.pallas import tpu as pltpu

NEG_INF = float(np.finfo(np.float32).min)


# ---------------------------------------------------------------------------
# helpers
# ---------------------------------------------------------------------------
def _pick_tile(n, target, granule):
    """Largest divisor of n that is <= target and a multiple of `granule`,
    falling back to the full dim (always a legal block)."""
    if n <= target:
        return n
    t = (target // granule) * granule
    while t >= granule:
        if n % t == 0:
            return t
        t -= granule
    return n


def _vmem_limit(block_bytes):
    # blocks are double-buffered by the pipeline; add headroom, clamp to a
    # range that is safe on v5e/v6e (128 MiB) and v7x (64 MiB physical VMEM).
    est = int(block_bytes * 2.5)
    return min(max(est, 16 * 1024 * 1024), 48 * 1024 * 1024)


# ---------------------------------------------------------------------------
# scaled_dot kernels: grid = (B, klen_tiles), heads fused per step
# ---------------------------------------------------------------------------
def _scaled_dot_body(key_ref, query_ref, wk_ref, bk_ref, wq_ref, bq_ref,
                     out_ref, mask_ref, *, inv_scale, n_heads, d_k):
    k = key_ref[0]                                    # [klen_t, kdim]
    q = query_ref[0]                                  # [qlen,  qdim]

    # Fused full-width projections (lane-dense N = adim), f32 accumulate.
    kp = jnp.dot(k, wk_ref[...], preferred_element_type=jnp.float32) + bk_ref[...]
    qp = jnp.dot(q, wq_ref[...], preferred_element_type=jnp.float32) + bq_ref[...]

    if mask_ref is not None:
        is_pad = mask_ref[0].astype(jnp.int32) == 0   # [qlen, klen_t]

    for h in range(n_heads):                          # static unroll over heads
        qh = qp[:, h * d_k:(h + 1) * d_k]             # [qlen,  d_k]
        kh = kp[:, h * d_k:(h + 1) * d_k]             # [klen_t, d_k]
        # q @ k^T without explicit transpose (contract last dims on MXU).
        e = lax.dot_general(qh, kh, (((1,), (1,)), ((), ())),
                            preferred_element_type=jnp.float32) * inv_scale
        if mask_ref is not None:
            e = jnp.where(is_pad, jnp.float32(NEG_INF), e)
        out_ref[0, h] = e


def _scaled_dot_kernel_masked(key_ref, query_ref, mask_ref, wk_ref, bk_ref,
                              wq_ref, bq_ref, out_ref, *,
                              inv_scale, n_heads, d_k):
    _scaled_dot_body(key_ref, query_ref, wk_ref, bk_ref, wq_ref, bq_ref,
                     out_ref, mask_ref,
                     inv_scale=inv_scale, n_heads=n_heads, d_k=d_k)


def _scaled_dot_kernel_nomask(key_ref, query_ref, wk_ref, bk_ref,
                              wq_ref, bq_ref, out_ref, *,
                              inv_scale, n_heads, d_k):
    _scaled_dot_body(key_ref, query_ref, wk_ref, bk_ref, wq_ref, bq_ref,
                     out_ref, None,
                     inv_scale=inv_scale, n_heads=n_heads, d_k=d_k)


def chunk_energy_scaled_dot(key, query, mask, w_key, b_key, w_query, b_query,
                            n_heads, *, klen_tile_target=512):
    B, klen, kdim = key.shape
    _, qlen, qdim = query.shape
    adim = w_key.shape[1]
    assert adim % n_heads == 0
    d_k = adim // n_heads
    inv_scale = 1.0 / math.sqrt(adim)

    klen_t = _pick_tile(klen, klen_tile_target, 128)
    n_kt = klen // klen_t

    bk2 = b_key.reshape(1, adim)
    bq2 = b_query.reshape(1, adim)

    blk_bytes = (klen_t * kdim * 4 + qlen * qdim * 4
                 + (qlen * klen_t if mask is not None else 0)        # int8 mask
                 + kdim * adim * 4 + qdim * adim * 4 + 2 * adim * 4
                 + n_heads * qlen * klen_t * 4)

    kw = dict(inv_scale=inv_scale, n_heads=n_heads, d_k=d_k)
    data_specs = [
        pl.BlockSpec((1, klen_t, kdim), lambda b, kt: (b, kt, 0)),   # key
        pl.BlockSpec((1, qlen, qdim),   lambda b, kt: (b, 0, 0)),    # query
    ]
    weight_specs = [
        pl.BlockSpec((kdim, adim), lambda b, kt: (0, 0)),            # w_key
        pl.BlockSpec((1, adim),    lambda b, kt: (0, 0)),            # b_key
        pl.BlockSpec((qdim, adim), lambda b, kt: (0, 0)),            # w_query
        pl.BlockSpec((1, adim),    lambda b, kt: (0, 0)),            # b_query
    ]
    out_spec = pl.BlockSpec((1, n_heads, qlen, klen_t),
                            lambda b, kt: (b, 0, 0, kt))
    cp = pltpu.CompilerParams(
        dimension_semantics=("parallel", "parallel"),
        vmem_limit_bytes=_vmem_limit(blk_bytes))
    out_shape = jax.ShapeDtypeStruct((B, n_heads, qlen, klen), jnp.float32)

    if mask is not None:
        mask8 = mask.astype(jnp.int8)
        kernel = functools.partial(_scaled_dot_kernel_masked, **kw)
        in_specs = (data_specs
                    + [pl.BlockSpec((1, qlen, klen_t), lambda b, kt: (b, 0, kt))]
                    + weight_specs)
        return pl.pallas_call(
            kernel, out_shape=out_shape, grid=(B, n_kt),
            in_specs=in_specs, out_specs=out_spec, compiler_params=cp,
        )(key, query, mask8, w_key, bk2, w_query, bq2)
    else:
        kernel = functools.partial(_scaled_dot_kernel_nomask, **kw)
        in_specs = data_specs + weight_specs
        return pl.pallas_call(
            kernel, out_shape=out_shape, grid=(B, n_kt),
            in_specs=in_specs, out_specs=out_spec, compiler_params=cp,
        )(key, query, w_key, bk2, w_query, bq2)


# ---------------------------------------------------------------------------
# additive kernels (n_heads == 1): grid = (B, qlen_tiles, klen_tiles)
# ---------------------------------------------------------------------------
def _add_body(key_ref, query_ref, wk_ref, bk_ref, wq_ref, v_ref,
              out_ref, mask_ref, *, qlen_t):
    k = key_ref[0]                                     # [klen_t, kdim]
    q = query_ref[0]                                   # [qlen_t, qdim]
    kp = jnp.dot(k, wk_ref[...], preferred_element_type=jnp.float32) + bk_ref[...]
    qp = jnp.dot(q, wq_ref[...], preferred_element_type=jnp.float32)   # no bias
    v_row = v_ref[...]                                 # [1, adim]

    if mask_ref is not None:
        is_pad = mask_ref[0].astype(jnp.int32) == 0    # [qlen_t, klen_t]

    # Static unroll over the (small) query tile.  The relu intermediate is
    # bounded to [klen_t, adim], and the v-reduction is a single MXU
    # contraction producing a lane-dense [1, klen_t] row per query position.
    # TODO(synk): for very long qlen with no tileable divisor, switch to a
    # lax.fori_loop with dynamic row slices to bound the unroll.
    for qi in range(qlen_t):
        x = jnp.maximum(kp + qp[qi:qi + 1, :], 0.0)    # [klen_t, adim]
        row = lax.dot_general(v_row, x, (((1,), (1,)), ((), ())),
                              preferred_element_type=jnp.float32)   # [1, klen_t]
        if mask_ref is not None:
            row = jnp.where(is_pad[qi:qi + 1, :], jnp.float32(NEG_INF), row)
        out_ref[0, 0, pl.ds(qi, 1), :] = row


def _add_kernel_masked(key_ref, query_ref, mask_ref, wk_ref, bk_ref, wq_ref,
                       v_ref, out_ref, *, qlen_t):
    _add_body(key_ref, query_ref, wk_ref, bk_ref, wq_ref, v_ref,
              out_ref, mask_ref, qlen_t=qlen_t)


def _add_kernel_nomask(key_ref, query_ref, wk_ref, bk_ref, wq_ref,
                       v_ref, out_ref, *, qlen_t):
    _add_body(key_ref, query_ref, wk_ref, bk_ref, wq_ref, v_ref,
              out_ref, None, qlen_t=qlen_t)


def chunk_energy_add(key, query, mask, w_key, b_key, w_query, v,
                     *, klen_tile_target=512, qlen_tile_target=16):
    B, klen, kdim = key.shape
    _, qlen, qdim = query.shape
    adim = w_key.shape[1]

    klen_t = _pick_tile(klen, klen_tile_target, 128)
    qlen_t = _pick_tile(qlen, qlen_tile_target, 8)
    n_kt = klen // klen_t
    n_qt = qlen // qlen_t

    bk2 = b_key.reshape(1, adim)
    v2 = v.reshape(1, adim)

    blk_bytes = (klen_t * kdim * 4 + qlen_t * qdim * 4
                 + (qlen_t * klen_t if mask is not None else 0)      # int8 mask
                 + kdim * adim * 4 + qdim * adim * 4 + 2 * adim * 4
                 + qlen_t * klen_t * 4
                 + klen_t * adim * 4)                                # live relu tile

    kw = dict(qlen_t=qlen_t)
    data_specs = [
        pl.BlockSpec((1, klen_t, kdim), lambda b, qt, kt: (b, kt, 0)),   # key
        pl.BlockSpec((1, qlen_t, qdim), lambda b, qt, kt: (b, qt, 0)),   # query
    ]
    weight_specs = [
        pl.BlockSpec((kdim, adim), lambda b, qt, kt: (0, 0)),            # w_key
        pl.BlockSpec((1, adim),    lambda b, qt, kt: (0, 0)),            # b_key
        pl.BlockSpec((qdim, adim), lambda b, qt, kt: (0, 0)),            # w_query
        pl.BlockSpec((1, adim),    lambda b, qt, kt: (0, 0)),            # v
    ]
    out_spec = pl.BlockSpec((1, 1, qlen_t, klen_t),
                            lambda b, qt, kt: (b, 0, qt, kt))
    cp = pltpu.CompilerParams(
        dimension_semantics=("parallel", "parallel", "parallel"),
        vmem_limit_bytes=_vmem_limit(blk_bytes))
    out_shape = jax.ShapeDtypeStruct((B, 1, qlen, klen), jnp.float32)

    if mask is not None:
        mask8 = mask.astype(jnp.int8)
        kernel = functools.partial(_add_kernel_masked, **kw)
        in_specs = (data_specs
                    + [pl.BlockSpec((1, qlen_t, klen_t),
                                    lambda b, qt, kt: (b, qt, kt))]
                    + weight_specs)
        return pl.pallas_call(
            kernel, out_shape=out_shape, grid=(B, n_qt, n_kt),
            in_specs=in_specs, out_specs=out_spec, compiler_params=cp,
        )(key, query, mask8, w_key, bk2, w_query, v2)
    else:
        kernel = functools.partial(_add_kernel_nomask, **kw)
        in_specs = data_specs + weight_specs
        return pl.pallas_call(
            kernel, out_shape=out_shape, grid=(B, n_qt, n_kt),
            in_specs=in_specs, out_specs=out_spec, compiler_params=cp,
        )(key, query, w_key, bk2, w_query, v2)


# ---------------------------------------------------------------------------
# Module-like wrapper with deterministic in-script parameter init.
# ---------------------------------------------------------------------------
class ChunkEnergy:
    def __init__(self, kdim, qdim, adim, atype, n_heads=1, bias=True, seed=0):
        assert adim % n_heads == 0
        self.atype = atype
        self.n_heads = n_heads
        self.d_k = adim // n_heads
        self.scale = math.sqrt(adim)

        k0, k1, k2 = jax.random.split(jax.random.PRNGKey(seed), 3)
        # Weights stored as [in_dim, out_dim].
        self.w_key = (jax.random.normal(k0, (kdim, adim), jnp.float32)
                      / math.sqrt(kdim))
        self.w_query = (jax.random.normal(k1, (qdim, adim), jnp.float32)
                        / math.sqrt(qdim))
        if atype == 'add':
            # w_key has bias; w_query bias=False; v: Linear(adim, 1, bias=False)
            self.b_key = 0.01 * jnp.arange(adim, dtype=jnp.float32)
            self.b_query = None
            self.v = (jax.random.normal(k2, (adim,), jnp.float32)
                      / math.sqrt(adim))
        elif atype == 'scaled_dot':
            if bias:
                self.b_key = 0.01 * jnp.arange(adim, dtype=jnp.float32)
                self.b_query = -0.02 * jnp.arange(adim, dtype=jnp.float32)
            else:
                self.b_key = jnp.zeros((adim,), jnp.float32)
                self.b_query = jnp.zeros((adim,), jnp.float32)
            self.v = None
        else:
            raise NotImplementedError(atype)

    def __call__(self, key, query, mask):
        # TODO(synk): cache=True key/mask caching semantics not reproduced
        # (stateless forward; equivalent to cache=False).
        if self.atype == 'scaled_dot':
            return chunk_energy_scaled_dot(
                key, query, mask, self.w_key, self.b_key,
                self.w_query, self.b_query, self.n_heads)
        else:  # 'add'
            assert self.n_heads == 1, "additive ChunkEnergy uses a single head"
            return chunk_energy_add(
                key, query, mask, self.w_key, self.b_key, self.w_query, self.v)


# ---------------------------------------------------------------------------
# Pure-JAX references for verification.
# ---------------------------------------------------------------------------
def ref_scaled_dot(key, query, mask, Wk, bk, Wq, bq, H):
    B, klen, _ = key.shape
    qlen = query.shape[1]
    adim = Wk.shape[1]
    d_k = adim // H
    kp = (key @ Wk + bk).reshape(B, klen, H, d_k).transpose(0, 2, 1, 3)
    qp = (query @ Wq + bq).reshape(B, qlen, H, d_k).transpose(0, 2, 1, 3)
    e = jnp.einsum('bhqd,bhkd->bhqk', qp, kp) / math.sqrt(adim)
    if mask is not None:
        e = jnp.where(mask[:, None, :, :] == 0, NEG_INF, e)
    return e


def ref_add(key, query, mask, Wk, bk, Wq, v):
    kp = key @ Wk + bk              # [B, klen, adim]
    qp = query @ Wq                 # [B, qlen, adim]
    e3 = jax.nn.relu(qp[:, :, None, :] + kp[:, None, :, :])
    e = jnp.einsum('bqka,a->bqk', e3, v)[:, None, :, :]
    if mask is not None:
        e = jnp.where(mask[:, None, :, :] == 0, NEG_INF, e)
    return e


if __name__ == "__main__":
    rng = jax.random.PRNGKey(0)
    B, klen, qlen = 2, 16, 8
    kdim, qdim, adim, H = 32, 32, 32, 4

    r0, r1, r2 = jax.random.split(rng, 3)
    key_in = jax.random.normal(r0, (B, klen, kdim), jnp.float32)
    query_in = jax.random.normal(r1, (B, qlen, qdim), jnp.float32)
    mask_in = (jax.random.uniform(r2, (B, qlen, klen)) > 0.25).astype(jnp.int32)

    # scaled_dot, multi-head, with mask
    mod_sd = ChunkEnergy(kdim, qdim, adim, 'scaled_dot', n_heads=H, seed=0)
    e_sd = jax.block_until_ready(mod_sd(key_in, query_in, mask_in))
    e_sd_ref = ref_scaled_dot(key_in, query_in, mask_in,
                              mod_sd.w_key, mod_sd.b_key,
                              mod_sd.w_query, mod_sd.b_query, H)
    assert e_sd.shape == (B, H, qlen, klen)
    np.testing.assert_allclose(np.asarray(e_sd), np.asarray(e_sd_ref),
                               rtol=1e-5, atol=1e-5)

    # scaled_dot, mask=None (no mask stream at all)
    e_sd_nm = jax.block_until_ready(mod_sd(key_in, query_in, None))
    e_sd_nm_ref = ref_scaled_dot(key_in, query_in, None,
                                 mod_sd.w_key, mod_sd.b_key,
                                 mod_sd.w_query, mod_sd.b_query, H)
    np.testing.assert_allclose(np.asarray(e_sd_nm), np.asarray(e_sd_nm_ref),
                               rtol=1e-5, atol=1e-5)

    # additive, single head, with mask
    mod_add = ChunkEnergy(kdim, qdim, adim, 'add', n_heads=1, seed=1)
    e_add = jax.block_until_ready(mod_add(key_in, query_in, mask_in))
    e_add_ref = ref_add(key_in, query_in, mask_in,
                        mod_add.w_key, mod_add.b_key,
                        mod_add.w_query, mod_add.v)
    assert e_add.shape == (B, 1, qlen, klen)
    np.testing.assert_allclose(np.asarray(e_add), np.asarray(e_add_ref),
                               rtol=1e-5, atol=1e-5)

    # additive, mask=None
    e_add_nm = jax.block_until_ready(mod_add(key_in, query_in, None))
    e_add_nm_ref = ref_add(key_in, query_in, None,
                           mod_add.w_key, mod_add.b_key,
                           mod_add.w_query, mod_add.v)
    np.testing.assert_allclose(np.asarray(e_add_nm), np.asarray(e_add_nm_ref),
                               rtol=1e-5, atol=1e-5)

    print("KERNEL_OK")
</pallas_src>

<mosaic_0001>
module attributes {stable_mosaic.version = 11 : i64} {
  func.func @_scaled_dot_kernel_masked(%arg0: i32, %arg1: i32, %arg2: memref<1x16x32xf32, #tpu.memory_space<vmem>>, %arg3: memref<1x8x32xf32, #tpu.memory_space<vmem>>, %arg4: memref<1x8x16xi8, #tpu.memory_space<vmem>>, %arg5: memref<32x32xf32, #tpu.memory_space<vmem>>, %arg6: memref<1x32xf32, #tpu.memory_space<vmem>>, %arg7: memref<32x32xf32, #tpu.memory_space<vmem>>, %arg8: memref<1x32xf32, #tpu.memory_space<vmem>>, %arg9: memref<1x4x8x16xf32, #tpu.memory_space<vmem>>) attributes {dimension_semantics = [#tpu.dimension_semantics<parallel>, #tpu.dimension_semantics<parallel>], iteration_bounds = array<i64: 2, 1>, scalar_prefetch = 0 : i64, scratch_operands = 0 : i64, tpu.core_type = #tpu.core_type<tc>, window_params = [{transform_indices = @transform_0, window_bounds = array<i64: 1, 16, 32>}, {transform_indices = @transform_1, window_bounds = array<i64: 1, 8, 32>}, {transform_indices = @transform_2, window_bounds = array<i64: 1, 8, 16>}, {pipeline_mode = #tpu.pipeline_mode<synchronous>, transform_indices = @transform_3, window_bounds = array<i64: 32, 32>}, {pipeline_mode = #tpu.pipeline_mode<synchronous>, transform_indices = @transform_4, window_bounds = array<i64: 1, 32>}, {pipeline_mode = #tpu.pipeline_mode<synchronous>, transform_indices = @transform_5, window_bounds = array<i64: 32, 32>}, {pipeline_mode = #tpu.pipeline_mode<synchronous>, transform_indices = @transform_6, window_bounds = array<i64: 1, 32>}, {transform_indices = @transform_7, window_bounds = array<i64: 1, 4, 8, 16>}]} {
    %c0 = arith.constant 0 : index
    %c0_0 = arith.constant 0 : index
    %c0_1 = arith.constant 0 : index
    %0 = vector.load %arg2[%c0, %c0_0, %c0_1] : memref<1x16x32xf32, #tpu.memory_space<vmem>>, vector<1x16x32xf32>
    %1 = vector.shape_cast %0 : vector<1x16x32xf32> to vector<16x32xf32>
    %c0_2 = arith.constant 0 : index
    %c0_3 = arith.constant 0 : index
    %c0_4 = arith.constant 0 : index
    %2 = vector.load %arg3[%c0_2, %c0_3, %c0_4] : memref<1x8x32xf32, #tpu.memory_space<vmem>>, vector<1x8x32xf32>
    %3 = vector.shape_cast %2 : vector<1x8x32xf32> to vector<8x32xf32>
    %c0_5 = arith.constant 0 : index
    %c0_6 = arith.constant 0 : index
    %4 = vector.load %arg5[%c0_5, %c0_6] : memref<32x32xf32, #tpu.memory_space<vmem>>, vector<32x32xf32>
    %cst = arith.constant dense<0.000000e+00> : vector<16x32xf32>
    %5 = tpu.matmul %1, %4, %cst {dimension_numbers = #tpu.dot_dimension_numbers<[1], [0], [0], [1], [0, 0, 1, 1], [], []>} : vector<16x32xf32>, vector<32x32xf32>, vector<16x32xf32> -> vector<16x32xf32>
    %c0_7 = arith.constant 0 : index
    %c0_8 = arith.constant 0 : index
    %6 = vector.load %arg6[%c0_7, %c0_8] : memref<1x32xf32, #tpu.memory_space<vmem>>, vector<1x32xf32>
    %7 = vector.broadcast %6 : vector<1x32xf32> to vector<16x32xf32>
    %8 = arith.addf %5, %7 : vector<16x32xf32>
    %c0_9 = arith.constant 0 : index
    %c0_10 = arith.constant 0 : index
    %9 = vector.load %arg7[%c0_9, %c0_10] : memref<32x32xf32, #tpu.memory_space<vmem>>, vector<32x32xf32>
    %cst_11 = arith.constant dense<0.000000e+00> : vector<8x32xf32>
    %10 = tpu.matmul %3, %9, %cst_11 {dimension_numbers = #tpu.dot_dimension_numbers<[1], [0], [0], [1], [0, 0, 1, 1], [], []>} : vector<8x32xf32>, vector<32x32xf32>, vector<8x32xf32> -> vector<8x32xf32>
    %c0_12 = arith.constant 0 : index
    %c0_13 = arith.constant 0 : index
    %11 = vector.load %arg8[%c0_12, %c0_13] : memref<1x32xf32, #tpu.memory_space<vmem>>, vector<1x32xf32>
    %12 = vector.broadcast %11 : vector<1x32xf32> to vector<8x32xf32>
    %13 = arith.addf %10, %12 : vector<8x32xf32>
    %c0_14 = arith.constant 0 : index
    %c0_15 = arith.constant 0 : index
    %c0_16 = arith.constant 0 : index
    %14 = vector.load %arg4[%c0_14, %c0_15, %c0_16] : memref<1x8x16xi8, #tpu.memory_space<vmem>>, vector<1x8x16xi8>
    %15 = vector.shape_cast %14 : vector<1x8x16xi8> to vector<8x16xi8>
    %16 = arith.extsi %15 : vector<8x16xi8> to vector<8x16xi32>
    %c0_i32 = arith.constant 0 : i32
    %17 = vector.broadcast %c0_i32 : i32 to vector<8x16xi32>
    %18 = arith.cmpi eq, %16, %17 : vector<8x16xi32>
    %19 = vector.extract_strided_slice %13 {offsets = [0, 0], sizes = [8, 8], strides = [1, 1]} : vector<8x32xf32> to vector<8x8xf32>
    %20 = vector.extract_strided_slice %8 {offsets = [0, 0], sizes = [16, 8], strides = [1, 1]} : vector<16x32xf32> to vector<16x8xf32>
    %cst_17 = arith.constant dense<0.000000e+00> : vector<8x16xf32>
    %21 = tpu.matmul %19, %20, %cst_17 {dimension_numbers = #tpu.dot_dimension_numbers<[1], [1], [0], [0], [0, 0, 1, 0], [], []>} : vector<8x8xf32>, vector<16x8xf32>, vector<8x16xf32> -> vector<8x16xf32>
    %cst_18 = arith.constant 0.176776692 : f32
    %22 = vector.broadcast %cst_18 : f32 to vector<8x16xf32>
    %23 = arith.mulf %21, %22 : vector<8x16xf32>
    %cst_19 = arith.constant -3.40282347E+38 : f32
    %24 = vector.broadcast %cst_19 : f32 to vector<8x16xf32>
    %25 = arith.select %18, %24, %23 : vector<8x16xi1>, vector<8x16xf32>
    %c0_20 = arith.constant 0 : index
    %c0_21 = arith.constant 0 : index
    %c0_22 = arith.constant 0 : index
    %c0_23 = arith.constant 0 : index
    %26 = vector.load %arg9[%c0_20, %c0_21, %c0_22, %c0_23] : memref<1x4x8x16xf32, #tpu.memory_space<vmem>>, vector<1x1x8x16xf32>
    %27 = vector.shape_cast %26 : vector<1x1x8x16xf32> to vector<8x16xf32>
    %28 = vector.shape_cast %25 : vector<8x16xf32> to vector<1x1x8x16xf32>
    tpu.vector_store %arg9[%c0_20, %c0_21, %c0_22, %c0_23], %28 {strides = array<i32>} : memref<1x4x8x16xf32, #tpu.memory_space<vmem>>, vector<1x1x8x16xf32>,
    %29 = vector.extract_strided_slice %13 {offsets = [0, 8], sizes = [8, 8], strides = [1, 1]} : vector<8x32xf32> to vector<8x8xf32>
    %30 = vector.extract_strided_slice %8 {offsets = [0, 8], sizes = [16, 8], strides = [1, 1]} : vector<16x32xf32> to vector<16x8xf32>
    %cst_24 = arith.constant dense<0.000000e+00> : vector<8x16xf32>
    %31 = tpu.matmul %29, %30, %cst_24 {dimension_numbers = #tpu.dot_dimension_numbers<[1], [1], [0], [0], [0, 0, 1, 0], [], []>} : vector<8x8xf32>, vector<16x8xf32>, vector<8x16xf32> -> vector<8x16xf32>
    %cst_25 = arith.constant 0.176776692 : f32
    %32 = vector.broadcast %cst_25 : f32 to vector<8x16xf32>
    %33 = arith.mulf %31, %32 : vector<8x16xf32>
    %cst_26 = arith.constant -3.40282347E+38 : f32
    %34 = vector.broadcast %cst_26 : f32 to vector<8x16xf32>
    %35 = arith.select %18, %34, %33 : vector<8x16xi1>, vector<8x16xf32>
    %c0_27 = arith.constant 0 : index
    %c1 = arith.constant 1 : index
    %c0_28 = arith.constant 0 : index
    %c0_29 = arith.constant 0 : index
    %36 = vector.load %arg9[%c0_27, %c1, %c0_28, %c0_29] : memref<1x4x8x16xf32, #tpu.memory_space<vmem>>, vector<1x1x8x16xf32>
    %37 = vector.shape_cast %36 : vector<1x1x8x16xf32> to vector<8x16xf32>
    %38 = vector.shape_cast %35 : vector<8x16xf32> to vector<1x1x8x16xf32>
    tpu.vector_store %arg9[%c0_27, %c1, %c0_28, %c0_29], %38 {strides = array<i32>} : memref<1x4x8x16xf32, #tpu.memory_space<vmem>>, vector<1x1x8x16xf32>,
    %39 = vector.extract_strided_slice %13 {offsets = [0, 16], sizes = [8, 8], strides = [1, 1]} : vector<8x32xf32> to vector<8x8xf32>
    %40 = vector.extract_strided_slice %8 {offsets = [0, 16], sizes = [16, 8], strides = [1, 1]} : vector<16x32xf32> to vector<16x8xf32>
    %cst_30 = arith.constant dense<0.000000e+00> : vector<8x16xf32>
    %41 = tpu.matmul %39, %40, %cst_30 {dimension_numbers = #tpu.dot_dimension_numbers<[1], [1], [0], [0], [0, 0, 1, 0], [], []>} : vector<8x8xf32>, vector<16x8xf32>, vector<8x16xf32> -> vector<8x16xf32>
    %cst_31 = arith.constant 0.176776692 : f32
    %42 = vector.broadcast %cst_31 : f32 to vector<8x16xf32>
    %43 = arith.mulf %41, %42 : vector<8x16xf32>
    %cst_32 = arith.constant -3.40282347E+38 : f32
    %44 = vector.broadcast %cst_32 : f32 to vector<8x16xf32>
    %45 = arith.select %18, %44, %43 : vector<8x16xi1>, vector<8x16xf32>
    %c0_33 = arith.constant 0 : index
    %c2 = arith.constant 2 : index
    %c0_34 = arith.constant 0 : index
    %c0_35 = arith.constant 0 : index
    %46 = vector.load %arg9[%c0_33, %c2, %c0_34, %c0_35] : memref<1x4x8x16xf32, #tpu.memory_space<vmem>>, vector<1x1x8x16xf32>
    %47 = vector.shape_cast %46 : vector<1x1x8x16xf32> to vector<8x16xf32>
    %48 = vector.shape_cast %45 : vector<8x16xf32> to vector<1x1x8x16xf32>
    tpu.vector_store %arg9[%c0_33, %c2, %c0_34, %c0_35], %48 {strides = array<i32>} : memref<1x4x8x16xf32, #tpu.memory_space<vmem>>, vector<1x1x8x16xf32>,
    %49 = vector.extract_strided_slice %13 {offsets = [0, 24], sizes = [8, 8], strides = [1, 1]} : vector<8x32xf32> to vector<8x8xf32>
    %50 = vector.extract_strided_slice %8 {offsets = [0, 24], sizes = [16, 8], strides = [1, 1]} : vector<16x32xf32> to vector<16x8xf32>
    %cst_36 = arith.constant dense<0.000000e+00> : vector<8x16xf32>
    %51 = tpu.matmul %49, %50, %cst_36 {dimension_numbers = #tpu.dot_dimension_numbers<[1], [1], [0], [0], [0, 0, 1, 0], [], []>} : vector<8x8xf32>, vector<16x8xf32>, vector<8x16xf32> -> vector<8x16xf32>
    %cst_37 = arith.constant 0.176776692 : f32
    %52 = vector.broadcast %cst_37 : f32 to vector<8x16xf32>
    %53 = arith.mulf %51, %52 : vector<8x16xf32>
    %cst_38 = arith.constant -3.40282347E+38 : f32
    %54 = vector.broadcast %cst_38 : f32 to vector<8x16xf32>
    %55 = arith.select %18, %54, %53 : vector<8x16xi1>, vector<8x16xf32>
    %c0_39 = arith.constant 0 : index
    %c3 = arith.constant 3 : index
    %c0_40 = arith.constant 0 : index
    %c0_41 = arith.constant 0 : index
    %56 = vector.load %arg9[%c0_39, %c3, %c0_40, %c0_41] : memref<1x4x8x16xf32, #tpu.memory_space<vmem>>, vector<1x1x8x16xf32>
    %57 = vector.shape_cast %56 : vector<1x1x8x16xf32> to vector<8x16xf32>
    %58 = vector.shape_cast %55 : vector<8x16xf32> to vector<1x1x8x16xf32>
    tpu.vector_store %arg9[%c0_39, %c3, %c0_40, %c0_41], %58 {strides = array<i32>} : memref<1x4x8x16xf32, #tpu.memory_space<vmem>>, vector<1x1x8x16xf32>,
    return
  }
  func.func @transform_0(%arg0: i32, %arg1: i32) -> (i32, i32, i32) {
    %c0_i32 = arith.constant 0 : i32
    %c0_i32_0 = arith.constant 0 : i32
    return %arg0, %arg1, %c0_i32 : i32, i32, i32
  }
  func.func @transform_1(%arg0: i32, %arg1: i32) -> (i32, i32, i32) {
    %c0_i32 = arith.constant 0 : i32
    %c0_i32_0 = arith.constant 0 : i32
    %c0_i32_1 = arith.constant 0 : i32
    return %arg0, %c0_i32, %c0_i32_0 : i32, i32, i32
  }
  func.func @transform_2(%arg0: i32, %arg1: i32) -> (i32, i32, i32) {
    %c0_i32 = arith.constant 0 : i32
    %c0_i32_0 = arith.constant 0 : i32
    return %arg0, %c0_i32, %arg1 : i32, i32, i32
  }
  func.func @transform_3(%arg0: i32, %arg1: i32) -> (i32, i32) {
    %c0_i32 = arith.constant 0 : i32
    %c0_i32_0 = arith.constant 0 : i32
    %c0_i32_1 = arith.constant 0 : i32
    return %c0_i32, %c0_i32_0 : i32, i32
  }
  func.func @transform_4(%arg0: i32, %arg1: i32) -> (i32, i32) {
    %c0_i32 = arith.constant 0 : i32
    %c0_i32_0 = arith.constant 0 : i32
    %c0_i32_1 = arith.constant 0 : i32
    return %c0_i32, %c0_i32_0 : i32, i32
  }
  func.func @transform_5(%arg0: i32, %arg1: i32) -> (i32, i32) {
    %c0_i32 = arith.constant 0 : i32
    %c0_i32_0 = arith.constant 0 : i32
    %c0_i32_1 = arith.constant 0 : i32
    return %c0_i32, %c0_i32_0 : i32, i32
  }
  func.func @transform_6(%arg0: i32, %arg1: i32) -> (i32, i32) {
    %c0_i32 = arith.constant 0 : i32
    %c0_i32_0 = arith.constant 0 : i32
    %c0_i32_1 = arith.constant 0 : i32
    return %c0_i32, %c0_i32_0 : i32, i32
  }
  func.func @transform_7(%arg0: i32, %arg1: i32) -> (i32, i32, i32, i32) {
    %c0_i32 = arith.constant 0 : i32
    %c0_i32_0 = arith.constant 0 : i32
    %c0_i32_1 = arith.constant 0 : i32
    return %arg0, %c0_i32, %c0_i32_0, %arg1 : i32, i32, i32, i32
  }
}

</mosaic_0001>

<bundles_post_ra>
// kernel: tpu_custom_call.1
= control target key start
LH: loop header
LB: loop body
LE: loop exit
PB: predicated region body
PF: predicated region fallthrough
CT: control target
= control target key end

     0   :  { %s1995_s0 = inlined_call_operand.hbm [shape: f32[2,16,32], index: 0, kind: input, shape index: {}]   ;;  %s1996_s1 = inlined_call_operand.hbm [shape: f32[2,8,32], index: 1, kind: input, shape index: {}]   ;;  %s1997_s2 = inlined_call_operand.vmem [shape: s8[2,8,16], index: 2, kind: input, shape index: {}]   ;;  %s1998_s3 = inlined_call_operand.hbm [shape: f32[32,32], index: 3, kind: input, shape index: {}]   ;;  %s1999_s4 = inlined_call_operand.vmem [shape: f32[1,32], index: 4, kind: input, shape index: {}]   ;;  %s2000_s5 = inlined_call_operand.hbm [shape: f32[32,32], index: 5, kind: input, shape index: {}]   ;;  %s2001_s6 = inlined_call_operand.vmem [shape: f32[1,32], index: 6, kind: input, shape index: {}]   ;;  %s2002_s7 = inlined_call_operand.hbm [shape: f32[2,4,8,16], index: 7, kind: output, shape index: {}]  }
   0x1   :  { %2012 = sst [smem:[#allocation20_spill]] %s1995_s0 }
   0x2   :  { %2013 = sst [smem:[#allocation21_spill]] %s1998_s3 }
   0x3   :  { %2014 = sst [smem:[#allocation22_spill]] %s2000_s5 }
   0x4   :  { %12 = vsyncpa [#allocation3], 0 }
   0x5   :  { %14 = vsyncpa [#allocation3 + $0x1], 0 }
   0x6   :  { %15 = vsyncpa [#allocation6], 0 }
   0x7   :  { %17 = vsyncpa [#allocation6 + $0x1], 0 }
   0x8   :  { %18 = vsyncpa [#allocation9], 0 }
   0x9   :  { %19 = vsyncpa [#allocation4], 0 }
   0xa   :  { %21 = vsyncpa [#allocation4 + $0x1], 0  ;;  %s1621_s24 = smov 0   ;;  %s1623_s25 = smov 0  }
   0xb   :  { %s1625_s26 = smov 0   ;;  %s1627_s27 = smov 0  }
   0xc   :  { %s1629_s28 = smov 0   ;;  %s1631_s29 = smov 0  }
   0xd LB: > { %2015 = sst [smem:[#allocation16_spill]] %s1552_s26  ;;  %s1652_s30 = sadd.s32 4294967295, %s1564_s29   ;;  %s1564_s29 = sphi %s1631_s29, %s27_s29   ;;  %s1560_s28 = sphi %s1629_s28, %s2052_s28   ;;  %s1556_s27 = sphi %s1627_s27, %s2051_s27   ;;  %s1552_s26 = sphi %s1625_s26, %s2047_s26   ;;  %s1548_s25 = sphi %s1623_s25, %s2050_s25   ;;  %s1544_s24 = sphi %s1621_s24, %s2049_s24  }
   0xe   : > { %s1094_s8 = sadd.s32 4294967294, %s1564_s29   ;;  %p61_p0 = scmp.ne.s32.totalorder %s1548_s25, %s1544_s24 }
   0xf   : > { %p2003_p1 = scmp.eq.s32.totalorder %s1652_s30, 0  ;;  %p231_p3 = scmp.eq.s32.totalorder %s1094_s8, 1 }
  0x10   : > { %p1095_p5 = scmp.ge.s32.totalorder %s1564_s29, 1  ;;  %p238_p7 = scmp.lt.s32.totalorder %s1564_s29, 3 }
  0x11   : > { %p1661_p4 = por %p2003_p1, %p61_p0  ;;  %p1666_p6 = por %p231_p3, %p61_p0 }
  0x12   : > { %p1671_p8 = pnand %p1095_p5, %p238_p7  ;;  %s1566_s12 = smov [#allocation7]  }
  0x13   : > { %s2016_s9 = scalar_select %p1661_p4, 1, 0 }
  0x14   : > { %s2017_s10 = scalar_select %p1666_p6, 1, 0 }
  0x15   : > { %s2019_s11 = scalar_select %p1671_p8, 1, 0 }
  0x16   : > { %2018 = sst [smem:[#allocation17_spill]] %s2017_s10  ;;  %s250_s13 = sshll.u32 %s1566_s12, 4  ;;  %s1675_s13 = int_to_ptr.vmem [resolvable:$true] %s250_s13 }
  0x17   : > { %p1255_p9 = pneg %p1671_p8  ;;  %s1567_s15 = smov [#allocation8]  }
  0x18   : > { %s266_s16 = sshll.u32 %s1567_s15, 4  ;;  %s2021_s3 = sld [smem:[#allocation21_spill]]  ;;  %s1686_s16 = int_to_ptr.vmem [resolvable:$true] %s266_s16 }
  0x19   : > { %p1682_p11 = pnand %p1255_p9, %p2003_p1 }
  0x1b   : > { %p1356_p13 = pneg %p1682_p11 }
  0x1e   : > { %s1354_s19 = scalar_lea.hbm %s2021_s3, 512 }
  0x1f   : > { %p1355_p12 = scmp.ne.s32.totalorder %s2021_s3, %s1354_s19  ;;  %p1361_p5 = scmp.lt.u32.totalorder %s1354_s19, %s2021_s3 }
  0x21   : > { %p1357_p0 = pnand %p1356_p13, %p1355_p12 }
  0x23   : > { %p1358_p3 = pneg %p1357_p0 }
  0x25   : > { %p1363_p7 = pnand %p1361_p5, %p1358_p3 }
  0x27   : > { %1366 = shalt.err (!%p1363_p7)
}
  0x28   : > { %s1367_s8 = scalar_lea.vmem %s1675_s13, 512  ;;  %p1375_p2 = scmp.lt.s32.totalorder %s1675_s13, %s1675_s13 }
  0x29   : > { %p1368_p9 = scmp.ne.s32.totalorder %s1675_s13, %s1367_s8  ;;  %p1376_p12 = scmp.lt.s32.totalorder %s1367_s8, %s1367_s8 }
  0x2b   : > { %p1370_p10 = pnand %p1368_p9, %p1356_p13  ;;  %p1377_p0 = por %p1376_p12, %p1375_p2 }
  0x2d   : > { %p1371_p1 = pneg %p1370_p10 }
  0x2f   : > { %p1378_p6 = pnand %p1377_p0, %p1371_p1 }
  0x31   : > { %1381 = shalt.err (!%p1378_p6)
}
  0x32   : > { %s2005_s12 = smov 128   ;;  %s2006_s15 = smov 8  }
  0x33   : > { %1258 = dma.hbm_to_vmem [thread:$0]  (!%p1682_p11), %s2021_s3, 512, %s1675_s13, [#allocation6], %s2005_s12, %s2005_s12, %s2006_s15  }
  0x34   : > { %s2022_s5 = sld [smem:[#allocation22_spill]] }
  0x3a   : > { %s1382_s21 = scalar_lea.hbm %s2022_s5, 512 }
  0x3b   : > { %p1383_p1 = scmp.ne.s32.totalorder %s2022_s5, %s1382_s21  ;;  %p1389_p10 = scmp.lt.u32.totalorder %s1382_s21, %s2022_s5 }
  0x3d   : > { %p1385_p2 = pnand %p1383_p1, %p1356_p13 }
  0x3f   : > { %p1386_p6 = pneg %p1385_p2 }
  0x41   : > { %p1391_p3 = pnand %p1389_p10, %p1386_p6 }
  0x43   : > { %1394 = shalt.err (!%p1391_p3)
}
  0x44   : > { %s1395_s13 = scalar_lea.vmem %s1686_s16, 512  ;;  %p1403_p12 = scmp.lt.s32.totalorder %s1686_s16, %s1686_s16 }
  0x45   : > { %p1396_p5 = scmp.ne.s32.totalorder %s1686_s16, %s1395_s13  ;;  %p1404_p0 = scmp.lt.s32.totalorder %s1395_s13, %s1395_s13 }
  0x47   : > { %p1398_p7 = pnand %p1396_p5, %p1356_p13  ;;  %p1405_p1 = por %p1404_p0, %p1403_p12 }
  0x49   : > { %p1399_p9 = pneg %p1398_p7 }
  0x4b   : > { %p1406_p2 = pnand %p1405_p1, %p1399_p9 }
  0x4d   : > { %1409 = shalt.err (!%p1406_p2)
}
  0x4e   : > { %1261 = dma.hbm_to_vmem [thread:$0]  (!%p1682_p11), %s2022_s5, 512, %s1686_s16, [#allocation9], %s2005_s12, %s2005_s12, %s2006_s15  }
  0x4f   : > { %s39_s14 = sadd.s32 1, %s1560_s28  ;;  %s48_s18 = sadd.s32 1, %s1552_s26 }
  0x50   : > { %p41_p13 = scmp.ge.s32.totalorder %s39_s14, 2  ;;  %p55_p6 = scmp.ne.s32.totalorder %s1552_s26, %s1548_s25 }
  0x51   : > { %p56_p10 = scmp.eq.s32.totalorder %s1564_s29, 0  ;;  %p1275_p3 = scmp.lt.s32.totalorder %s1564_s29, 2 }
  0x52   : > { %s2054_s14 = smov (%p41_p13, %s39_s14), 0  ;;  %p2024_p7 = scmp.eq.s32.totalorder %s1652_s30, 1 }
  0x53   : > { %2023 = sst [smem:[#allocation18_spill]] %s2054_s14  ;;  %p57_p5 = por %p56_p10, %p55_p6 }
  0x54   : > { %p1756_p9 = por %p2024_p7, %p55_p6  ;;  %s43_s20 = ssub.s32 %s1560_s28, %s2054_s14 }
  0x55   : > { %s1763_s21 = sand.u32 1, %s1552_s26   ;;  %p46_p11 = scmp.eq.s32.totalorder %s43_s20, 0 }
  0x56   : > { %s2025_s19 = scalar_select %p1756_p9, 1, 0 }
  0x57   : > { %s1099_s16 = sshll.u32 %s1763_s21, 4  ;;  %s1136_s22 = sshll.u32 %s1560_s28, 8 }
  0x58   : > { %s1768_s23 = scalar_select %p46_p11, %s1552_s26, %s48_s18  }
  0x59   : > { %s2027_s0 = sld [smem:[#allocation20_spill]]  ;;  %s287_s17 = scalar_lea.vmem [#allocation2], %s1099_s16 }
  0x5a   : > { %2026 = sst [smem:[#allocation19_spill]] %s1768_s23  ;;  %s296_s12 = sshll.u32 %s287_s17, 4  ;;  %s1781_s12 = int_to_ptr.vmem [resolvable:$true] %s296_s12 }
  0x5b   : > { %p1777_p12 = pnand %p1275_p3, %p57_p5  ;;  %s284_s20 = scalar_lea.sflag [#allocation3], %s1763_s21 }
  0x5d   : > { %p1412_p1 = pneg %p1777_p12 }
  0x5f   : > { %s1773_s10 = scalar_lea.hbm %s2027_s0, %s1136_s22  ;;  %s1415_s13 = scalar_lea.hbm %s2027_s0, 512 }
  0x60   : > { %s1410_s8 = scalar_lea.hbm %s1773_s10, 256  ;;  %p1416_p6 = scmp.lt.u32.totalorder %s1773_s10, %s2027_s0 }
  0x61   : > { %p1411_p0 = scmp.ne.s32.totalorder %s1773_s10, %s1410_s8  ;;  %p1417_p10 = scmp.lt.u32.totalorder %s1415_s13, %s1410_s8 }
  0x62   : > { %p1419_p5 = scmp.lt.u32.totalorder %s1410_s8, %s1773_s10 }
  0x63   : > { %p1413_p2 = pnand %p1412_p1, %p1411_p0  ;;  %p1418_p3 = por %p1417_p10, %p1416_p6 }
  0x65   : > { %p1414_p13 = pneg %p1413_p2  ;;  %p1420_p7 = por %p1419_p5, %p1418_p3 }
  0x67   : > { %p1421_p11 = pnand %p1420_p7, %p1414_p13 }
  0x69   : > { %1424 = shalt.err (!%p1421_p11)
}
  0x6a   : > { %s1425_s18 = scalar_lea.vmem %s1781_s12, 256  ;;  %s1570_s16 = smov [#allocation2]  }
  0x6b   : > { %p1426_p0 = scmp.ne.s32.totalorder %s1781_s12, %s1425_s18  ;;  %s1430_s22 = sshll.u32 %s1570_s16, 4  ;;  %s1431_s22 = int_to_ptr.vmem [resolvable:$false] %s1430_s22 }
  0x6c   : > { %s1432_s3 = scalar_lea.vmem %s1431_s22, 512  ;;  %p1433_p4 = scmp.lt.s32.totalorder %s1781_s12, %s1431_s22 }
  0x6d   : > { %p1428_p2 = pnand %p1426_p0, %p1412_p1  ;;  %p1434_p6 = scmp.lt.s32.totalorder %s1432_s3, %s1425_s18 }
  0x6f   : > { %p1429_p9 = pneg %p1428_p2  ;;  %p1435_p10 = por %p1434_p6, %p1433_p4 }
  0x71   : > { %p1436_p3 = pnand %p1435_p10, %p1429_p9 }
  0x73   : > { %1439 = shalt.err (!%p1436_p3)
}
  0x74   : > { %s2029_s8 = smov 8   ;;  %s2030_s13 = smov 128  }
  0x75   : > { %1265 = dma.hbm_to_vmem [thread:$0]  (!%p1777_p12), %s1773_s10, 256, %s1781_s12, %s284_s20, %s2030_s13, %s2030_s13, %s2029_s8  }
  0x76   : > { %s1102_s17 = sshll.u32 %s1763_s21, 3  ;;  %s1103_s16 = sshll.u32 %s1560_s28, 7 }
  0x77   : > { %s1820_s3 = scalar_lea.hbm %s1996_s1, %s1103_s16  ;;  %s310_s0 = scalar_lea.vmem [#allocation5], %s1102_s17 }
  0x78   : > { %s317_s5 = sshll.u32 %s310_s0, 4  ;;  %s2031_s14 = sand.u32 1, %s1564_s29   ;;  %s318_s5 = int_to_ptr.vmem [resolvable:$true] %s317_s5 }
  0x79   : > { %s307_s23 = scalar_lea.sflag [#allocation6], %s2031_s14  ;;  %s1440_s26 = scalar_lea.hbm %s1820_s3, 128 }
  0x7a   : > { %p1441_p4 = scmp.ne.s32.totalorder %s1820_s3, %s1440_s26  ;;  %s1445_s10 = scalar_lea.hbm %s1996_s1, 256 }
  0x7b   : > { %p1446_p5 = scmp.lt.u32.totalorder %s1820_s3, %s1996_s1  ;;  %p1447_p7 = scmp.lt.u32.totalorder %s1445_s10, %s1440_s26 }
  0x7c   : > { %p1443_p9 = pnand %p1441_p4, %p1412_p1  ;;  %p1449_p0 = scmp.lt.u32.totalorder %s1440_s26, %s1820_s3 }
  0x7d   : > { %p1448_p11 = por %p1447_p7, %p1446_p5 }
  0x7e   : > { %p1444_p13 = pneg %p1443_p9 }
  0x7f   : > { %p1450_p2 = por %p1449_p0, %p1448_p11 }
  0x81   : > { %p1451_p6 = pnand %p1450_p2, %p1444_p13 }
  0x83   : > { %1454 = shalt.err (!%p1451_p6)
}
  0x84   : > { %s1455_s0 = scalar_lea.vmem %s318_s5, 128  ;;  %s1571_s14 = smov [#allocation5]  }
  0x85   : > { %p1456_p10 = scmp.ne.s32.totalorder %s318_s5, %s1455_s0  ;;  %s1460_s13 = sshll.u32 %s1571_s14, 4  ;;  %s1461_s13 = int_to_ptr.vmem [resolvable:$false] %s1460_s13 }
  0x86   : > { %s1462_s17 = scalar_lea.vmem %s1461_s13, 256  ;;  %p1463_p9 = scmp.lt.s32.totalorder %s318_s5, %s1461_s13 }
  0x87   : > { %p1458_p3 = pnand %p1456_p10, %p1412_p1  ;;  %p1464_p8 = scmp.lt.s32.totalorder %s1462_s17, %s1455_s0 }
  0x89   : > { %p1459_p4 = pneg %p1458_p3  ;;  %p1465_p5 = por %p1464_p8, %p1463_p9 }
  0x8b   : > { %p1466_p7 = pnand %p1465_p5, %p1459_p4 }
  0x8d   : > { %1469 = shalt.err (!%p1466_p7)
}
  0x8e   : > { %1268 = dma.hbm_to_vmem [thread:$0]  (!%p1777_p12), %s1820_s3, 128, %s318_s5, %s307_s23  }
  0x8f   : > { %p2032_p13 = scmp.ne.s32.totalorder %s2019_s11, 0 }
  0x90   : > { %s1846_s26 = sand.u32 (!%p2032_p13), 1, %s1548_s25   ;;  %p2033_p8 = scmp.ne.s32.totalorder (!%p2032_p13), %s2016_s9, 0 }
  0x91   : > { %336 = sbr.rel (%p2032_p13) target bundleno = 756 (0x2f4), region = 48  ;;  %s1105_s16 = sshll.u32 (!%p2032_p13), %s1846_s26, 4 }
  0x92   : > { %s339_s18 = scalar_lea.sflag (!%p2032_p13), [#allocation3], %s1846_s26  ;;  %s1850_s22 = scalar_lea.vmem (!%p2032_p13), [#allocation2], %s1105_s16 }
  0x98   : > { %1523 = dma.done.wait (%p2033_p8), %s339_s18, 256  }
  0x99   : > { %1525 = vsyncadd (%p2033_p8), %s339_s18, 4294967040  ;;  %s347_s5 = sand.u32 1, %s1652_s30   ;;  %s1106_s11 = sshll.u32 %s1846_s26, 3 }
  0x9a   : > { %s348_s15 = scalar_lea.sflag [#allocation6], %s347_s5  ;;  %s1858_s23 = scalar_lea.vmem [#allocation5], %s1106_s11 }
  0x9b   : > { %1527 = dma.done.wait (%p2033_p8), %s348_s15, 128  }
  0x9c   : > { %1529 = vsyncadd (%p2033_p8), %s348_s15, 4294967168  ;;  %p2034_p12 = scmp.eq.s32.totalorder %s1652_s30, 0 }
  0x9e   : > { %1531 = dma.done.wait (%p2034_p12), [#allocation6], 512   ;;  %p2035_p1 = pmov %p2034_p12 }
  0xa0   : > { %1533 = vsyncadd (%p2035_p1), [#allocation6], 4294966784  ;;  %p2036_p11 = pmov %p2035_p1 }
  0xa1   : > { %p2037_p0 = pmov %p2035_p1 }
  0xa2   : > { %1535 = dma.done.wait (%p2036_p11), [#allocation9], 512  }
  0xa3   : > { %1537 = vsyncadd (%p2037_p0), [#allocation9], 4294966784  ;;  %v1572_v0 = vmov 0.0|0.0   ;;  %vm1573_vm0 = vmmov 0   ;;  %v1574_v1 = vmov 0.0   ;;  %vm424_vm1 = vcmask 261120  }
  0xa4   : > { %1219 = vmatprep.subr.bf16.mxu1 %v1572_v0  ;;  %1180 = vmatprep.mubr.msk.f32.mxu1 %vm1573_vm0, %v1574_v1  ;;  %v413_v2 = vld [vmem:[#allocation7] sm:$0xff]  ;;  %v414_v3 = vld [vmem:[#allocation7 + $0x8] sm:$0xff]  ;;  %v415_v4 = vld [vmem:[#allocation7 + $0x10] sm:$0xff]  ;;  %vm593_vm2 = vcmask 64512   ;;  %s1575_s21 = smov 104   ;;  %s1576_s10 = smov 120  }
  0xa5   : > { %v1211_v5 = vpack.c.bf16 %v414_v3, %v413_v2  ;;  %v416_v6 = vld [vmem:[#allocation7 + $0x18] sm:$0xff]  ;;  %v410_v7 = vld [vmem:[%s1850_s22] sm:$0xff]  ;;  %v507_v10 = vld [vmem:[#allocation8 + $0x8] sm:$0xff]  ;;  %s1577_s20 = smov 112   ;;  %p403_p2 = scmp.lt.s32.totalorder %s1556_s27, 1  ;;  %vm675_vm5 = vcmask 130048  }
  0xa6   : > { %v1215_v8 = vpack.c.bf16 %v416_v6, %v415_v4  ;;  %1169 = vmatprep.mubr.msk.f32.mxu0 %vm424_vm1, %v410_v7  ;;  %v506_v9 = vld [vmem:[#allocation8] sm:$0xff]  ;;  %v508_v11 = vld [vmem:[#allocation8 + $0x10] sm:$0xff]  ;;  %v509_v13 = vld [vmem:[#allocation8 + $0x18] sm:$0xff]  ;;  %s1109_s16 = sshll.u32 %s1846_s26, 5  ;;  %s1137_s5 = sshll.u32 %s1556_s27, 9 }
  0xa7   : > { %1212 = vmatprep.subr.bf16.mxu0 %v1211_v5  ;;  %v1220_v12 = vpack.c.bf16 %v507_v10, %v506_v9  ;;  %v1223_v14 = vpack.c.bf16 %v509_v13, %v508_v11  ;;  %v411_v15 = vld [vmem:[%s1850_s22 + $0x8] sm:$0xff]  ;;  %v412_v16 = vld [vmem:[%s1858_s23] sm:$0xff]  ;;  %vm1896_vm3 = vmpackc.low %vm593_vm2, %vm593_vm2  ;;  %s404_s8 = scalar_select %p403_p2, %s1556_s27, 1 }
  0xa8   : > { %1214 = vmatpush3.bf16.msra.mxu0 %v1211_v5  ;;  %v1111_v17 = vld [vmem:[%s1999_s4] ss:$0 sm:$0xff]  ;;  %s401_s18 = scalar_lea.vmem [#allocation10], %s1109_s16  ;;  %s1943_s23 = scalar_lea.hbm %s2002_s7, %s1137_s5 }
  0xa9   : > { %1216 = vmatprep.subr.bf16.mxu0 %v1215_v8  ;;  %1221 = vmatpush3.bf16.msra.mxu1 %v1220_v12  ;;  %v1114_v24 = vld [vmem:[%s2001_s6] ss:$0 sm:$0xff]  ;;  %s1110_s0 = sshll.u32 %s404_s8, 1  ;;  %s950_s22 = sshll.u32 %s401_s18, 4  ;;  %s1937_s22 = int_to_ptr.vmem [resolvable:$true] %s950_s22 }
  0xaa   : > { %1222 = vmatprep.subr.bf16.mxu1 %v1572_v0  ;;  %s409_s17 = scalar_lea.vmem %s1997_s2, %s1110_s0  ;;  %s936_s27 = scalar_lea.sflag [#allocation4], %s1846_s26 }
  0xab   : > { %v590_v44 = vld [vmem:[%s409_s17] sm:$0x3]  ;;  %s1470_s30 = scalar_lea.vmem %s1937_s22, 512  ;;  %p2042_p10 = scmp.ne.s32.totalorder %s2025_s19, 0 }
  0xac   : > { %1218 = vmatpush3.bf16.msra.mxu0 %v1215_v8  ;;  %v591_v45 = vunpack.c.0.s8 %v590_v44  ;;  %p1471_p6 = scmp.ne.s32.totalorder %s1937_s22, %s1470_s30  ;;  %s1578_s9 = smov [#allocation10]  }
  0xad   : > { %1224 = vmatpush3.bf16.msra.mxu1 %v1223_v14  ;;  %1225 = vmatprep.subr.bf16.mxu0 %v1572_v0  ;;  %s1474_s3 = sshll.u32 %s1578_s9, 4  ;;  %s1475_s3 = int_to_ptr.vmem [resolvable:$false] %s1474_s3 }
  0xae   : > { %1229 = vmatprep.subr.bf16.mxu1 %v1572_v0  ;;  %vm1924_vm4 = vcmp.eq.s32.totalorder %v591_v45, 0  ;;  %p1472_p3 = pnand %p1471_p6, %p2042_p10  ;;  %s1476_s12 = scalar_lea.vmem %s1475_s3, 1024 }
  0xaf   : > { %1170 = vmatmul.mubr.msk.f32.vlgmr.msra.gmra.mrb[0].mxu0 %vm424_vm1, %v411_v15  ;;  %p1477_p9 = scmp.lt.s32.totalorder %s1937_s22, %s1475_s3  ;;  %p1478_p5 = scmp.lt.s32.totalorder %s1476_s12, %s1470_s30 }
  0xb0   : > { %1181 = vmatmul.mubr.msk.f32.vlgmr.msra.gmra.mrb[0].mxu1 %vm424_vm1, %v412_v16  ;;  %1187 = vmatprep.mubr.msk.f32.mxu0 %vm1573_vm0, %v1574_v1  ;;  %p1473_p4 = pneg %p1472_p3 }
  0xb1   : > { %1194 = vmatprep.mubr.msk.f32.mxu1 %vm1573_vm0, %v1574_v1  ;;  %p1479_p7 = por %p1478_p5, %p1477_p9 }
  0xb3   : > { %p1480_p13 = pnand %p1479_p7, %p1473_p4 }
 0x182   : > { %v1171_v18 = vpop.f32.mrb[0].mxu0 }
 0x183   : > { %v503_v19 = vadd.f32 %v1171_v18, %v1111_v17  ;;  %v497_v20 = vpop.f32.mrb[1].mxu0  ;;  %v586_v21 = vpop.f32.mrb[0].mxu1 }
 0x184   : > { %v498_v22 = vadd.f32 %v1111_v17, %v497_v20  ;;  %v1182_v23 = vpop.f32.mrb[1].mxu1  ;;  %v587_v28 = vadd.f32 %v1114_v24, %v586_v21 }
 0x186   : > { %v1226_v25 = vpack.c.bf16 %v503_v19, %v498_v22  ;;  %v1349_v26 = vpack.i.bf16 %v503_v19, %v498_v22 }
 0x188   : > { %1350 = vrot.lane.b32.xlu1 %v1349_v26, %s1575_s21  ;;  %1340 = vrot.lane.b32.xlu0 %v1349_v26, %s1576_s10 }
 0x189   : > { %1228 = vmatpush3.bf16.xpose.msk.msra.mxu0 %vm1896_vm3, %v1226_v25 }
 0x18a   : > { %1233 = vmatprep.subr.bf16.mxu0 %v1572_v0 }
 0x18c   : > { %1345 = vrot.lane.b32.xlu0 %v1349_v26, %s1577_s20  ;;  %677 = vrot.lane.b32.xlu1 %v587_v28, %s1576_s10 }
 0x190   : > { %1188 = vmatmul.mubr.msk.f32.vlgmr.msra.gmra.mrb[2].mxu0 %vm593_vm2, %v587_v28  ;;  %849 = vrot.lane.b32.xlu1 %v587_v28, %s1575_s21 }
 0x191   : > { %763 = vrot.lane.b32.xlu0 %v587_v28, %s1577_s20  ;;  %1201 = vmatprep.mubr.msk.f32.mxu0 %vm1573_vm0, %v1574_v1 }
 0x1fa   : > { %v1341_v29 = vpop.permute.xlu0 %1340  ;;  %v1351_v33 = vpop.permute.xlu1 %1350 }
 0x1fb   : > { %v1343_v30 = vunpack.i.h.bf16 %v1341_v29  ;;  %v1342_v31 = vunpack.i.l.bf16 %v1341_v29  ;;  %v1353_v37 = vunpack.i.h.bf16 %v1351_v33  ;;  %v1352_v38 = vunpack.i.l.bf16 %v1351_v33 }
 0x1fd   : > { %v1230_v32 = vpack.c.bf16 %v1343_v30, %v1342_v31  ;;  %v1238_v40 = vpack.c.bf16 %v1353_v37, %v1352_v38 }
 0x1fe   : > { %v1346_v34 = vpop.permute.xlu0 %1345  ;;  %v678_v41 = vpop.permute.xlu1 %677 }
 0x1ff   : > { %v1348_v35 = vunpack.i.h.bf16 %v1346_v34  ;;  %v1347_v36 = vunpack.i.l.bf16 %v1346_v34  ;;  %1232 = vmatpush3.bf16.xpose.msk.msra.mxu1 %vm1896_vm3, %v1230_v32 }
 0x200   : > { %1237 = vmatprep.subr.bf16.mxu1 %v1572_v0 }
 0x201   : > { %v1234_v39 = vpack.c.bf16 %v1348_v35, %v1347_v36 }
 0x202   : > { %v850_v43 = vpop.permute.xlu1 %849 }
 0x203   : > { %1236 = vmatpush3.bf16.xpose.msk.msra.mxu0 %vm1896_vm3, %v1234_v39  ;;  %v764_v42 = vpop.permute.xlu0 %763 }
 0x206   : > { %1195 = vmatmul.mubr.msk.f32.vlgmr.msra.gmra.mrb[2].mxu1 %vm593_vm2, %v678_v41 }
 0x207   : > { %1240 = vmatpush3.bf16.xpose.msk.msra.mxu1 %vm1896_vm3, %v1238_v40  ;;  %1208 = vmatprep.mubr.msk.f32.mxu1 %vm1573_vm0, %v1574_v1 }
 0x20a   : > { %1202 = vmatmul.mubr.msk.f32.vlgmr.msra.gmra.mrb[4].mxu0 %vm593_vm2, %v764_v42 }
 0x20e   : > { %1209 = vmatmul.mubr.msk.f32.vlgmr.msra.gmra.mrb[4].mxu1 %vm593_vm2, %v850_v43 }
 0x263   : > { %v669_v47 = vpop.f32.mrb[2].mxu0 }
 0x264   : > { %v673_v48 = vmul.f32 0.17677669, %v669_v47  ;;  %v1189_v49 = vpop.f32.mrb[3].mxu0 }
 0x266   : > { %v674_v50 = vsel %vm1924_vm4, -3.4028235e+38, %v673_v48 }
 0x267   : > { %676 = vst.msk [vmem:[%s401_s18] sm:$0xff] %vm675_vm5, %v674_v50 }
 0x2d9   : > { %v755_v51 = vpop.f32.mrb[2].mxu1 }
 0x2da   : > { %v759_v52 = vmul.f32 0.17677669, %v755_v51  ;;  %v1196_v53 = vpop.f32.mrb[3].mxu1 }
 0x2dc   : > { %v760_v54 = vsel %vm1924_vm4, -3.4028235e+38, %v759_v52 }
 0x2dd   : > { %1122 = vst.msk [vmem:[%s401_s18 + $0x8] sm:$0xff] %vm675_vm5, %v760_v54  ;;  %v841_v55 = vpop.f32.mrb[4].mxu0 }
 0x2de   : > { %v845_v56 = vmul.f32 0.17677669, %v841_v55  ;;  %v1203_v57 = vpop.f32.mrb[5].mxu0 }
 0x2e0   : > { %v846_v58 = vsel %vm1924_vm4, -3.4028235e+38, %v845_v56 }
 0x2e1   : > { %1126 = vst.msk [vmem:[%s401_s18 + $0x10] sm:$0xff] %vm675_vm5, %v846_v58  ;;  %v927_v59 = vpop.f32.mrb[4].mxu1 }
 0x2e2   : > { %v931_v60 = vmul.f32 0.17677669, %v927_v59  ;;  %v1210_v61 = vpop.f32.mrb[5].mxu1 }
 0x2e4   : > { %v932_v62 = vsel %vm1924_vm4, -3.4028235e+38, %v931_v60 }
 0x2e5   : > { %1130 = vst.msk [vmem:[%s401_s18 + $0x18] sm:$0xff] %vm675_vm5, %v932_v62 }
 0x2e6   : > { %1483 = shalt.err (!%p1480_p13)
}
 0x2e7   : > { %s1484_s21 = scalar_lea.hbm %s1943_s23, 512  ;;  %s1488_s8 = scalar_lea.hbm %s2002_s7, 1024 }
 0x2e8   : > { %p1485_p8 = scmp.ne.s32.totalorder %s1943_s23, %s1484_s21  ;;  %p1489_p11 = scmp.lt.u32.totalorder %s1943_s23, %s2002_s7 }
 0x2e9   : > { %p1490_p0 = scmp.lt.u32.totalorder %s1488_s8, %s1484_s21  ;;  %p1492_p6 = scmp.lt.u32.totalorder %s1484_s21, %s1943_s23 }
 0x2ea   : > { %p1486_p12 = pnand %p1485_p8, %p2042_p10 }
 0x2eb   : > { %p1491_p2 = por %p1490_p0, %p1489_p11 }
 0x2ec   : > { %p1487_p1 = pneg %p1486_p12 }
 0x2ed   : > { %p1493_p3 = por %p1492_p6, %p1491_p2 }
 0x2ef   : > { %p1494_p4 = pnand %p1493_p3, %p1487_p1 }
 0x2f1   : > { %1497 = shalt.err (!%p1494_p4)
}
 0x2f2   : > { %s1579_s13 = smov 128   ;;  %s1580_s17 = smov 8  }
 0x2f3   : > { %1253 = dma.vmem_to_hbm [thread:$0]  (%p2042_p10), %s1937_s22, 512, %s1943_s23, %s936_s27, %s1579_s13, %s1579_s13, %s1580_s17  }
 0x2f4 PF: > { %s2043_s16 = sld [smem:[#allocation17_spill]]  ;;  %s965_s18 = sand.u32 1, %s1544_s24  }
 0x2f5   : > { %p2045_p5 = scmp.ge.s32.totalorder %s1564_s29, 2  ;;  %s966_s5 = scalar_lea.sflag [#allocation4], %s965_s18 }
 0x2fa   : > { %p2044_p9 = scmp.ne.s32.totalorder %s2043_s16, 0 }
 0x2fc   : > { %p1270_p7 = pnand %p2045_p5, %p2044_p9 }
 0x2fe   : > { %1539 = dma.done.wait (!%p1270_p7), %s966_s5, 512  }
 0x2ff   : > { %1541 = vsyncadd (!%p1270_p7), %s966_s5, 4294966784  ;;  %s27_s29 = sadd.s32 1, %s1564_s29   ;;  %s2046_s11 = sld [smem:[#allocation16_spill]] }
 0x300   : > { %p24_p13 = scmp.ge.s32.totalorder %s27_s29, 4   ;;  %s2047_s26 = sld [smem:[#allocation19_spill]] }
 0x301   : > { %s2048_s19 = sld [smem:[#allocation18_spill]]  ;;  %s2049_s24 = smov %s1548_s25 }
 0x302   : > { %s2051_s27 = smov %s1560_s28  ;;  %26 = sbr.rel (!%p24_p13) target bundleno = 13 (0xd), region = 120 }
 0x305   : > { %s2050_s25 = smov %s2046_s11 }
 0x307   : > { %s2052_s28 = smov %s2048_s19 }
 0x309   :  { %971 = vsyncpa [#allocation3], 1 }
 0x30a   :  { %973 = vsyncpa [#allocation3 + $0x1], 1 }
 0x30b   :  { %974 = vsyncpa [#allocation6], 1 }
 0x30c   :  { %976 = vsyncpa [#allocation6 + $0x1], 1 }
 0x30d   :  { %977 = vsyncpa [#allocation9], 1 }
 0x30e   :  { %978 = vsyncpa [#allocation4], 1 }
 0x30f   :  { %980 = vsyncpa [#allocation4 + $0x1], 1 }

</bundles_post_ra>
